<compile_context>
chip_gen: v5e
topology: v5e:2x2
jax: 0.10.0
libtpu: 0.0.40
codegen_flags: <defaults>
</compile_context>

<pallas_src>
import functools

import jax
import jax.numpy as jnp
import numpy as np
from jax.experimental import pallas as pl
from jax.experimental.pallas import tpu as pltpu

EPS = 1e-5


def _stats_kernel(x_ref, bt_ref, gamma_ref, beta_ref, p_ref,
                  scale_ref, shift_ref, sum_acc, sq_acc, *, inv_denom):
    """Pass 1: accumulate per-(channel, kernel-pos) sums; emit fused BN scale/shift."""
    n = pl.program_id(0)
    t = pl.program_id(1)

    @pl.when((n == 0) & (t == 0))
    def _init():
        sum_acc[...] = jnp.zeros_like(sum_acc)
        sq_acc[...] = jnp.zeros_like(sq_acc)

    # Transpose conv (k=2, s=2, no output overlap) as a lane-dense matmul:
    # (Ncol, Cin) @ (Cin, TILE) -> (Ncol, TILE)
    y = jnp.dot(bt_ref[...], x_ref[...], preferred_element_type=jnp.float32)
    sum_acc[...] += jnp.sum(y, axis=1, keepdims=True)        # lane-axis reduce (XLU)
    sq_acc[...] += jnp.sum(y * y, axis=1, keepdims=True)

    @pl.when((n == pl.num_programs(0) - 1) & (t == pl.num_programs(1) - 1))
    def _finalize():
        # Group the 4 kernel positions of each channel (and broadcast back) with
        # one tiny block-constant matrix; runs once per call.
        grp_sum = jnp.dot(p_ref[...], sum_acc[...], preferred_element_type=jnp.float32)
        grp_sq = jnp.dot(p_ref[...], sq_acc[...], preferred_element_type=jnp.float32)
        mean = grp_sum * inv_denom
        var = grp_sq * inv_denom - mean * mean               # biased variance (training BN)
        inv_std = jax.lax.rsqrt(var + EPS)
        scale = gamma_ref[...] * inv_std                     # fold gamma * 1/std
        scale_ref[...] = scale
        shift_ref[...] = beta_ref[...] - mean * scale


def _apply_kernel(x_ref, bt_ref, scale_ref, shift_ref, o_ref):
    """Pass 2: recompute the cheap matmul, fuse BN affine + ReLU, lane-dense store."""
    y = jnp.dot(bt_ref[...], x_ref[...], preferred_element_type=jnp.float32)
    o_ref[...] = jnp.maximum(y * scale_ref[...] + shift_ref[...], 0.0)


def _pick_tile(hw, cap=2048):
    """Largest lane tile <= cap that divides hw (multiple of 128), else full hw."""
    if hw <= cap or hw % 128 != 0:
        return hw
    t = cap - (cap % 128)
    while t >= 128:
        if hw % t == 0:
            return t
        t -= 128
    return hw


def transpose_convolution_forward(x, w, bias, gamma, beta):
    """x: (N, Cin, H, W) NCHW.  w: (Cin, Cout, 2, 2) (PyTorch ConvTranspose2d layout).
    Returns (N, Cout, 2H, 2W) NCHW, matching
    nn.Sequential(ConvTranspose2d(Cin, Cout, 2, 2), BatchNorm2d(Cout), ReLU())
    in training mode (batch statistics)."""
    del bias  # per-channel constant -> exactly cancelled by BN's batch-mean subtraction
    N, Cin, H, W = x.shape
    w_cin, Cout, KH, KW = w.shape
    assert w_cin == Cin and (KH, KW) == (2, 2)

    Hw = H * W
    Ncol = Cout * 4
    TILE = _pick_tile(Hw)
    T = Hw // TILE

    # Only free views / tiny constants on the wrapper side (no big XLA transposes of x).
    x2 = x.reshape(N * Cin, Hw).astype(jnp.float32)                  # contiguous NCHW view
    bt = jnp.transpose(w.reshape(Cin, Ncol)).astype(jnp.float32)     # (Ncol, Cin), row j = co*4+kh*2+kw
    gamma_col = jnp.repeat(gamma.astype(jnp.float32), 4).reshape(Ncol, 1)
    beta_col = jnp.repeat(beta.astype(jnp.float32), 4).reshape(Ncol, 1)
    p_mat = jnp.kron(jnp.eye(Cout, dtype=jnp.float32),
                     jnp.ones((4, 4), dtype=jnp.float32))            # within-channel group-sum

    inv_denom = 1.0 / float(N * Hw * 4)   # elements per channel = N * (2H) * (2W)

    x_spec = pl.BlockSpec((Cin, TILE), lambda n, t: (n, t))
    bt_spec = pl.BlockSpec((Ncol, Cin), lambda n, t: (0, 0))
    vec_spec = pl.BlockSpec((Ncol, 1), lambda n, t: (0, 0))

    # ---- Pass 1: statistics -> fused BN scale/shift (sequential accumulate) ----
    scale_col, shift_col = pl.pallas_call(
        functools.partial(_stats_kernel, inv_denom=inv_denom),
        out_shape=(jax.ShapeDtypeStruct((Ncol, 1), jnp.float32),
                   jax.ShapeDtypeStruct((Ncol, 1), jnp.float32)),
        grid=(N, T),
        in_specs=[x_spec, bt_spec, vec_spec, vec_spec,
                  pl.BlockSpec((Ncol, Ncol), lambda n, t: (0, 0))],
        out_specs=(vec_spec, vec_spec),
        scratch_shapes=[pltpu.VMEM((Ncol, 1), jnp.float32),
                        pltpu.VMEM((Ncol, 1), jnp.float32)],
        compiler_params=pltpu.CompilerParams(
            dimension_semantics=("arbitrary", "arbitrary")),
    )(x2, bt, gamma_col, beta_col, p_mat)

    # ---- Pass 2: matmul + BN affine + ReLU, lane-dense output, fully parallel ----
    y_t = pl.pallas_call(
        _apply_kernel,
        out_shape=jax.ShapeDtypeStruct((N * Ncol, Hw), jnp.float32),
        grid=(N, T),
        in_specs=[x_spec, bt_spec, vec_spec, vec_spec],
        out_specs=pl.BlockSpec((Ncol, TILE), lambda n, t: (n, t)),
        compiler_params=pltpu.CompilerParams(
            dimension_semantics=("parallel", "parallel")),
    )(x2, bt, scale_col, shift_col)

    # Output layout plumbing: (N*Ncol, Hw) -> NCHW (N, Cout, 2H, 2W).
    # TODO(synk): the (kh,kw)->pixel interleave stays as a wrapper-side XLA transpose;
    # doing it in-kernel would need cross lane/sublane shuffles for marginal gain.
    out = y_t.reshape(N, Cout, 2, 2, H, W)
    out = jnp.transpose(out, (0, 1, 4, 2, 5, 3)).reshape(N, Cout, 2 * H, 2 * W)
    return out


def _reference(x, w, bias, gamma, beta):
    """Pure-JAX reference: ConvTranspose2d(+bias) + BatchNorm2d(training) + ReLU."""
    N, Cin, H, W = x.shape
    _, Cout, _, _ = w.shape
    y = jnp.einsum('nchw,cokl->nohkwl', x, w)           # (N, Cout, H, 2, W, 2)
    y = y.reshape(N, Cout, 2 * H, 2 * W) + bias[None, :, None, None]
    mean = y.mean(axis=(0, 2, 3), keepdims=True)
    var = y.var(axis=(0, 2, 3), keepdims=True)          # biased variance (PyTorch training BN)
    y_hat = (y - mean) / jnp.sqrt(var + EPS)
    y_hat = y_hat * gamma[None, :, None, None] + beta[None, :, None, None]
    return jnp.maximum(y_hat, 0.0)


if __name__ == "__main__":
    # Module: TransposeConvolution(in_channels=4)
    #   ConvTranspose2d(in_channels*2=8 -> 4, kernel_size=2, stride=2) + BN(4) + ReLU
    in_channels = 4
    cin = in_channels * 2   # 8
    cout = in_channels      # 4
    N, H, W = 2, 16, 16

    key = jax.random.PRNGKey(0)
    k_x, k_w, k_b = jax.random.split(key, 3)

    x = jax.random.normal(k_x, (N, cin, H, W), dtype=jnp.float32)
    # ConvTranspose2d weight shape: (in_channels, out_channels, kH, kW)
    w = jax.random.normal(k_w, (cin, cout, 2, 2), dtype=jnp.float32) * 0.1
    bias = jax.random.normal(k_b, (cout,), dtype=jnp.float32) * 0.1
    # BatchNorm2d default init: weight=1, bias=0
    gamma = jnp.ones((cout,), dtype=jnp.float32)
    beta = jnp.zeros((cout,), dtype=jnp.float32)

    out = transpose_convolution_forward(x, w, bias, gamma, beta)
    out = jax.block_until_ready(out)

    ref = _reference(x, w, bias, gamma, beta)
    np.testing.assert_allclose(np.asarray(out), np.asarray(ref),
                               rtol=1e-4, atol=1e-4)
    assert out.shape == (N, cout, 2 * H, 2 * W)
    print("KERNEL_OK")
</pallas_src>

<mosaic_0001>
module attributes {stable_mosaic.version = 11 : i64} {
  func.func @_stats_kernel(%arg0: i32, %arg1: i32, %arg2: memref<8x256xf32, #tpu.memory_space<vmem>>, %arg3: memref<16x8xf32, #tpu.memory_space<vmem>>, %arg4: memref<16x1xf32, #tpu.memory_space<vmem>>, %arg5: memref<16x1xf32, #tpu.memory_space<vmem>>, %arg6: memref<16x16xf32, #tpu.memory_space<vmem>>, %arg7: memref<16x1xf32, #tpu.memory_space<vmem>>, %arg8: memref<16x1xf32, #tpu.memory_space<vmem>>, %arg9: memref<16x1xf32, #tpu.memory_space<vmem>>, %arg10: memref<16x1xf32, #tpu.memory_space<vmem>>) attributes {dimension_semantics = [#tpu.dimension_semantics<arbitrary>, #tpu.dimension_semantics<arbitrary>], iteration_bounds = array<i64: 2, 1>, scalar_prefetch = 0 : i64, scratch_operands = 2 : i64, tpu.core_type = #tpu.core_type<tc>, window_params = [{transform_indices = @transform_0, window_bounds = array<i64: 8, 256>}, {pipeline_mode = #tpu.pipeline_mode<synchronous>, transform_indices = @transform_1, window_bounds = array<i64: 16, 8>}, {pipeline_mode = #tpu.pipeline_mode<synchronous>, transform_indices = @transform_2, window_bounds = array<i64: 16, 1>}, {pipeline_mode = #tpu.pipeline_mode<synchronous>, transform_indices = @transform_3, window_bounds = array<i64: 16, 1>}, {pipeline_mode = #tpu.pipeline_mode<synchronous>, transform_indices = @transform_4, window_bounds = array<i64: 16, 16>}, {pipeline_mode = #tpu.pipeline_mode<synchronous>, transform_indices = @transform_5, window_bounds = array<i64: 16, 1>}, {pipeline_mode = #tpu.pipeline_mode<synchronous>, transform_indices = @transform_6, window_bounds = array<i64: 16, 1>}]} {
    %c0_i32 = arith.constant 0 : i32
    %0 = arith.cmpi eq, %arg0, %c0_i32 : i32
    %c0_i32_0 = arith.constant 0 : i32
    %1 = arith.cmpi eq, %arg1, %c0_i32_0 : i32
    %2 = arith.andi %0, %1 : i1
    %3 = arith.extui %2 : i1 to i32
    %c0_i32_1 = arith.constant 0 : i32
    %4 = arith.cmpi ne, %3, %c0_i32_1 : i32
    scf.if %4 {
      %cst_17 = arith.constant 0.000000e+00 : f32
      %24 = vector.broadcast %cst_17 : f32 to vector<16x1xf32>
      %c0_18 = arith.constant 0 : index
      %c0_19 = arith.constant 0 : index
      %25 = vector.load %arg9[%c0_18, %c0_19] : memref<16x1xf32, #tpu.memory_space<vmem>>, vector<16x1xf32>
      tpu.vector_store %arg9[%c0_18, %c0_19], %24 {strides = array<i32>} : memref<16x1xf32, #tpu.memory_space<vmem>>, vector<16x1xf32>,
      %cst_20 = arith.constant 0.000000e+00 : f32
      %26 = vector.broadcast %cst_20 : f32 to vector<16x1xf32>
      %c0_21 = arith.constant 0 : index
      %c0_22 = arith.constant 0 : index
      %27 = vector.load %arg10[%c0_21, %c0_22] : memref<16x1xf32, #tpu.memory_space<vmem>>, vector<16x1xf32>
      tpu.vector_store %arg10[%c0_21, %c0_22], %26 {strides = array<i32>} : memref<16x1xf32, #tpu.memory_space<vmem>>, vector<16x1xf32>,
    } else {
    }
    %c0 = arith.constant 0 : index
    %c0_2 = arith.constant 0 : index
    %5 = vector.load %arg3[%c0, %c0_2] : memref<16x8xf32, #tpu.memory_space<vmem>>, vector<16x8xf32>
    %c0_3 = arith.constant 0 : index
    %c0_4 = arith.constant 0 : index
    %6 = vector.load %arg2[%c0_3, %c0_4] : memref<8x256xf32, #tpu.memory_space<vmem>>, vector<8x256xf32>
    %cst = arith.constant dense<0.000000e+00> : vector<16x256xf32>
    %7 = tpu.matmul %5, %6, %cst {dimension_numbers = #tpu.dot_dimension_numbers<[1], [0], [0], [1], [0, 0, 1, 1], [], []>} : vector<16x8xf32>, vector<8x256xf32>, vector<16x256xf32> -> vector<16x256xf32>
    %c0_5 = arith.constant 0 : index
    %c0_6 = arith.constant 0 : index
    %8 = vector.load %arg9[%c0_5, %c0_6] : memref<16x1xf32, #tpu.memory_space<vmem>>, vector<16x1xf32>
    %cst_7 = arith.constant dense<0.000000e+00> : vector<16xf32>
    %9 = vector.multi_reduction <add>, %7, %cst_7 [1] : vector<16x256xf32> to vector<16xf32>
    %10 = vector.shape_cast %9 : vector<16xf32> to vector<16x1xf32>
    %11 = arith.addf %8, %10 : vector<16x1xf32>
    %c0_8 = arith.constant 0 : index
    %c0_9 = arith.constant 0 : index
    %12 = vector.load %arg9[%c0_8, %c0_9] : memref<16x1xf32, #tpu.memory_space<vmem>>, vector<16x1xf32>
    tpu.vector_store %arg9[%c0_8, %c0_9], %11 {strides = array<i32>} : memref<16x1xf32, #tpu.memory_space<vmem>>, vector<16x1xf32>,
    %c0_10 = arith.constant 0 : index
    %c0_11 = arith.constant 0 : index
    %13 = vector.load %arg10[%c0_10, %c0_11] : memref<16x1xf32, #tpu.memory_space<vmem>>, vector<16x1xf32>
    %14 = arith.mulf %7, %7 : vector<16x256xf32>
    %cst_12 = arith.constant dense<0.000000e+00> : vector<16xf32>
    %15 = vector.multi_reduction <add>, %14, %cst_12 [1] : vector<16x256xf32> to vector<16xf32>
    %16 = vector.shape_cast %15 : vector<16xf32> to vector<16x1xf32>
    %17 = arith.addf %13, %16 : vector<16x1xf32>
    %c0_13 = arith.constant 0 : index
    %c0_14 = arith.constant 0 : index
    %18 = vector.load %arg10[%c0_13, %c0_14] : memref<16x1xf32, #tpu.memory_space<vmem>>, vector<16x1xf32>
    tpu.vector_store %arg10[%c0_13, %c0_14], %17 {strides = array<i32>} : memref<16x1xf32, #tpu.memory_space<vmem>>, vector<16x1xf32>,
    %c1_i32 = arith.constant 1 : i32
    %19 = arith.cmpi eq, %arg0, %c1_i32 : i32
    %c0_i32_15 = arith.constant 0 : i32
    %20 = arith.cmpi eq, %arg1, %c0_i32_15 : i32
    %21 = arith.andi %19, %20 : i1
    %22 = arith.extui %21 : i1 to i32
    %c0_i32_16 = arith.constant 0 : i32
    %23 = arith.cmpi ne, %22, %c0_i32_16 : i32
    scf.if %23 {
      %c0_17 = arith.constant 0 : index
      %c0_18 = arith.constant 0 : index
      %24 = vector.load %arg6[%c0_17, %c0_18] : memref<16x16xf32, #tpu.memory_space<vmem>>, vector<16x16xf32>
      %c0_19 = arith.constant 0 : index
      %c0_20 = arith.constant 0 : index
      %25 = vector.load %arg9[%c0_19, %c0_20] : memref<16x1xf32, #tpu.memory_space<vmem>>, vector<16x1xf32>
      %cst_21 = arith.constant dense<0.000000e+00> : vector<16x1xf32>
      %26 = tpu.matmul %24, %25, %cst_21 {dimension_numbers = #tpu.dot_dimension_numbers<[1], [0], [0], [1], [0, 0, 1, 1], [], []>} : vector<16x16xf32>, vector<16x1xf32>, vector<16x1xf32> -> vector<16x1xf32>
      %c0_22 = arith.constant 0 : index
      %c0_23 = arith.constant 0 : index
      %27 = vector.load %arg6[%c0_22, %c0_23] : memref<16x16xf32, #tpu.memory_space<vmem>>, vector<16x16xf32>
      %c0_24 = arith.constant 0 : index
      %c0_25 = arith.constant 0 : index
      %28 = vector.load %arg10[%c0_24, %c0_25] : memref<16x1xf32, #tpu.memory_space<vmem>>, vector<16x1xf32>
      %cst_26 = arith.constant dense<0.000000e+00> : vector<16x1xf32>
      %29 = tpu.matmul %27, %28, %cst_26 {dimension_numbers = #tpu.dot_dimension_numbers<[1], [0], [0], [1], [0, 0, 1, 1], [], []>} : vector<16x16xf32>, vector<16x1xf32>, vector<16x1xf32> -> vector<16x1xf32>
      %cst_27 = arith.constant 4.8828125E-4 : f32
      %30 = vector.broadcast %cst_27 : f32 to vector<16x1xf32>
      %31 = arith.mulf %26, %30 : vector<16x1xf32>
      %cst_28 = arith.constant 4.8828125E-4 : f32
      %32 = vector.broadcast %cst_28 : f32 to vector<16x1xf32>
      %33 = arith.mulf %29, %32 : vector<16x1xf32>
      %34 = arith.mulf %31, %31 : vector<16x1xf32>
      %35 = arith.subf %33, %34 : vector<16x1xf32>
      %cst_29 = arith.constant 9.99999974E-6 : f32
      %36 = vector.broadcast %cst_29 : f32 to vector<16x1xf32>
      %37 = arith.addf %35, %36 : vector<16x1xf32>
      %38 = math.rsqrt %37 : vector<16x1xf32>
      %c0_30 = arith.constant 0 : index
      %c0_31 = arith.constant 0 : index
      %39 = vector.load %arg4[%c0_30, %c0_31] : memref<16x1xf32, #tpu.memory_space<vmem>>, vector<16x1xf32>
      %40 = arith.mulf %39, %38 : vector<16x1xf32>
      %c0_32 = arith.constant 0 : index
      %c0_33 = arith.constant 0 : index
      %41 = vector.load %arg7[%c0_32, %c0_33] : memref<16x1xf32, #tpu.memory_space<vmem>>, vector<16x1xf32>
      tpu.vector_store %arg7[%c0_32, %c0_33], %40 {strides = array<i32>} : memref<16x1xf32, #tpu.memory_space<vmem>>, vector<16x1xf32>,
      %c0_34 = arith.constant 0 : index
      %c0_35 = arith.constant 0 : index
      %42 = vector.load %arg5[%c0_34, %c0_35] : memref<16x1xf32, #tpu.memory_space<vmem>>, vector<16x1xf32>
      %43 = arith.mulf %31, %40 : vector<16x1xf32>
      %44 = arith.subf %42, %43 : vector<16x1xf32>
      %c0_36 = arith.constant 0 : index
      %c0_37 = arith.constant 0 : index
      %45 = vector.load %arg8[%c0_36, %c0_37] : memref<16x1xf32, #tpu.memory_space<vmem>>, vector<16x1xf32>
      tpu.vector_store %arg8[%c0_36, %c0_37], %44 {strides = array<i32>} : memref<16x1xf32, #tpu.memory_space<vmem>>, vector<16x1xf32>,
    } else {
    }
    return
  }
  func.func @transform_0(%arg0: i32, %arg1: i32) -> (i32, i32) {
    %c0_i32 = arith.constant 0 : i32
    return %arg0, %arg1 : i32, i32
  }
  func.func @transform_1(%arg0: i32, %arg1: i32) -> (i32, i32) {
    %c0_i32 = arith.constant 0 : i32
    %c0_i32_0 = arith.constant 0 : i32
    %c0_i32_1 = arith.constant 0 : i32
    return %c0_i32, %c0_i32_0 : i32, i32
  }
  func.func @transform_2(%arg0: i32, %arg1: i32) -> (i32, i32) {
    %c0_i32 = arith.constant 0 : i32
    %c0_i32_0 = arith.constant 0 : i32
    %c0_i32_1 = arith.constant 0 : i32
    return %c0_i32, %c0_i32_0 : i32, i32
  }
  func.func @transform_3(%arg0: i32, %arg1: i32) -> (i32, i32) {
    %c0_i32 = arith.constant 0 : i32
    %c0_i32_0 = arith.constant 0 : i32
    %c0_i32_1 = arith.constant 0 : i32
    return %c0_i32, %c0_i32_0 : i32, i32
  }
  func.func @transform_4(%arg0: i32, %arg1: i32) -> (i32, i32) {
    %c0_i32 = arith.constant 0 : i32
    %c0_i32_0 = arith.constant 0 : i32
    %c0_i32_1 = arith.constant 0 : i32
    return %c0_i32, %c0_i32_0 : i32, i32
  }
  func.func @transform_5(%arg0: i32, %arg1: i32) -> (i32, i32) {
    %c0_i32 = arith.constant 0 : i32
    %c0_i32_0 = arith.constant 0 : i32
    %c0_i32_1 = arith.constant 0 : i32
    return %c0_i32, %c0_i32_0 : i32, i32
  }
  func.func @transform_6(%arg0: i32, %arg1: i32) -> (i32, i32) {
    %c0_i32 = arith.constant 0 : i32
    %c0_i32_0 = arith.constant 0 : i32
    %c0_i32_1 = arith.constant 0 : i32
    return %c0_i32, %c0_i32_0 : i32, i32
  }
}

</mosaic_0001>

<bundles_post_ra>
// kernel: tpu_custom_call.1
= control target key start
LH: loop header
LB: loop body
LE: loop exit
PB: predicated region body
PF: predicated region fallthrough
CT: control target
= control target key end

     0   :  { %s632_s21 = smov 0   ;;  %s634_s22 = smov 0   ;;  %s714_s0 = inlined_call_operand.vmem [shape: f32[16,256], index: 0, kind: input, shape index: {}]   ;;  %s715_s1 = inlined_call_operand.vmem [shape: f32[16,8], index: 1, kind: input, shape index: {}]   ;;  %s716_s2 = inlined_call_operand.vmem [shape: f32[16,1], index: 2, kind: input, shape index: {}]   ;;  %s717_s3 = inlined_call_operand.vmem [shape: f32[16,1], index: 3, kind: input, shape index: {}]   ;;  %s718_s4 = inlined_call_operand.vmem [shape: f32[16,16], index: 4, kind: input, shape index: {}]   ;;  %s719_s5 = inlined_call_operand.vmem [shape: f32[16,1], index: 5, kind: output, shape index: {0}]   ;;  %s720_s6 = inlined_call_operand.vmem [shape: f32[16,1], index: 6, kind: output, shape index: {1}]  }
   0x1   :  { %s636_s23 = smov 0  }
   0x2 LB: > { %s29_s24 = sadd.s32 1, %s590_s22  ;;  %p519_p0 = scmp.ge.s32.totalorder %s594_s23, 1  ;;  %s594_s23 = sphi %s636_s23, %s17_s23   ;;  %s590_s22 = sphi %s634_s22, %s722_s22   ;;  %s586_s21 = sphi %s632_s21, %s721_s21  }
   0x3   : > { %p31_p1 = scmp.ge.s32.totalorder %s29_s24, 2  ;;  %p224_p2 = scmp.lt.s32.totalorder %s594_s23, 3 }
   0x5   : > { %s724_s24 = smov (%p31_p1, %s29_s24), 0  ;;  %p225_p3 = pnand %p519_p0, %p224_p2 }
   0x6   : > { %p254_p4 = scmp.lt.s32.totalorder (!%p225_p3), %s586_s21, 1  ;;  %p263_p5 = scmp.eq.s32.totalorder (!%p225_p3), %s586_s21, 0 }
   0x7   : > { %228 = sbr.rel (%p225_p3) target bundleno = 451 (0x1c3), region = 40 }
   0xc   : > { %s255_s25 = scalar_select %p254_p4, %s586_s21, 1  ;;  %vm269_vm0 = vcmask (%p263_p5), 7168   ;;  %v596_v0 = vmov (%p263_p5), 0.0  }
   0xd   : > { %268 = sbr.rel (!%p263_p5) target bundleno = 18 (0x12), region = 44  ;;  %270 = vst.msk [vmem:[#allocation2] sm:$0xff] (%p263_p5), %vm269_vm0, %v596_v0 }
   0xe   : > { %s534_s26 = sshll.u32 %s255_s25, 4  ;;  %271 = vst.msk [vmem:[#allocation2 + $0x8] sm:$0xff] (%p263_p5), %vm269_vm0, %v596_v0 }
   0xf   : > { %s261_s29 = scalar_lea.vmem %s714_s0, %s534_s26  ;;  %272 = vst.msk [vmem:[#allocation3] sm:$0xff] (%p263_p5), %vm269_vm0, %v596_v0 }
  0x10   : > { %273 = vst.msk [vmem:[#allocation3 + $0x8] sm:$0xff] (%p263_p5), %vm269_vm0, %v596_v0 }
  0x12 PF: > { %v276_v1 = vld [vmem:[%s261_s29] sm:$0xff]  ;;  %v277_v2 = vld [vmem:[%s261_s29 + $0x8] sm:$0xff]  ;;  %vm278_vm1 = vcmask 64512   ;;  %p360_p6 = scmp.eq.s32.totalorder %s586_s21, 1  ;;  %vm341_vm2 = vcmask 7168  }
  0x13   : > { %v274_v3 = vld [vmem:[%s715_s1] sm:$0xff]  ;;  %300 = vmatpush.msra.mxu0 %v276_v1  ;;  %323 = vmatpush.msra.mxu1 %v277_v2  ;;  %v275_v4 = vld [vmem:[%s715_s1 + $0x8] sm:$0xff]  ;;  %vm369_vm3 = vcmask (%p360_p6), 130048  }
  0x14   : > { %523 = vmatmul.msk.f32.vlgmr.msra.gmra.mxu0 %vm278_vm1, %v274_v3  ;;  %525 = vmatmul.msk.f32.vlgmr.msra.gmra.mxu1 %vm278_vm1, %v274_v3  ;;  %v331_v17 = vld [vmem:[#allocation2] sm:$0xff]  ;;  %v366_v33 = vld [vmem:[%s718_s4 + $0x8] sm:$0xff] (%p360_p6) }
  0x15   : > { %537 = vmatpush.msra.mxu2 %v276_v1  ;;  %538 = vmatpush.msra.mxu3 %v277_v2  ;;  %v332_v23 = vld [vmem:[#allocation2 + $0x8] sm:$0xff]  ;;  %v365_v32 = vld [vmem:[%s718_s4] sm:$0xff] (%p360_p6) }
  0x16   : > { %524 = vmatmul.msk.f32.vlgmr.msra.gmra.mxu2 %vm278_vm1, %v275_v4  ;;  %526 = vmatmul.msk.f32.vlgmr.msra.gmra.mxu3 %vm278_vm1, %v275_v4  ;;  %v344_v19 = vld [vmem:[#allocation3] sm:$0xff]  ;;  %v454_v57 = vld [vmem:[%s716_s2] sm:$0xff] (%p360_p6)  ;;  %v455_v2 = vld [vmem:[%s716_s2 + $0x8] sm:$0xff] (%p360_p6) }
  0x17   : > { %v345_v25 = vld [vmem:[#allocation3 + $0x8] sm:$0xff]  ;;  %v460_v62 = vld [vmem:[%s717_s3] sm:$0xff] (%p360_p6) }
  0x91   : > { %v302_v5 = vpop.f32.mrf.mxu0  ;;  %v325_v6 = vpop.f32.mrf.mxu1 }
  0x92   : > { %v346_v7 = vmul.f32 %v302_v5, %v302_v5  ;;  %v347_v8 = vmul.f32 %v325_v6, %v325_v6  ;;  %v333_v9 = vadd.f32 %v325_v6, %v302_v5  ;;  %v461_v6 = vld [vmem:[%s717_s3 + $0x8] sm:$0xff] (%p360_p6) }
  0x94   : > { %334 = vadd.xlane.f32.xlu0 %v333_v9  ;;  %v350_v10 = vadd.f32 %v347_v8, %v346_v7 }
  0x96   : > { %351 = vadd.xlane.f32.xlu1 %v350_v10 }
  0x99   : > { %v305_v11 = vpop.f32.mrf.mxu2  ;;  %v328_v12 = vpop.f32.mrf.mxu3 }
  0x9a   : > { %v348_v13 = vmul.f32 %v305_v11, %v305_v11  ;;  %v336_v14 = vadd.f32 %v328_v12, %v305_v11  ;;  %v349_v15 = vmul.f32 %v328_v12, %v328_v12 }
  0x9c   : > { %337 = vadd.xlane.f32.xlu0 %v336_v14  ;;  %v353_v16 = vadd.f32 %v349_v15, %v348_v13 }
  0x9e   : > { %354 = vadd.xlane.f32.xlu1 %v353_v16 }
 0x107   : > { %v335_v18 = vpop.xlane.xlu0 %334 }
 0x108   : > { %v339_v20 = vadd.f32 %v335_v18, %v331_v17 }
 0x109   : > { %v352_v21 = vpop.xlane.xlu1 %351 }
 0x10a   : > { %342 = vst.msk [vmem:[#allocation2] sm:$0xff] %vm341_vm2, %v339_v20  ;;  %v356_v22 = vadd.f32 %v352_v21, %v344_v19 }
 0x10c   : > { %358 = vst.msk [vmem:[#allocation3] sm:$0xff] %vm341_vm2, %v356_v22 }
 0x10f   : > { %v338_v24 = vpop.xlane.xlu0 %337 }
 0x110   : > { %v340_v26 = vadd.f32 %v338_v24, %v332_v23  ;;  %364 = sbr.rel (!%p360_p6) target bundleno = 451 (0x1c3), region = 48 }
 0x111   : > { %v355_v27 = vpop.xlane.xlu1 %354  ;;  %v367_v30 = vld [vmem:[#allocation2] sm:$0xff] (%p360_p6) }
 0x112   : > { %343 = vst.msk [vmem:[#allocation2 + $0x8] sm:$0xff] %vm341_vm2, %v340_v26  ;;  %v357_v28 = vadd.f32 %v355_v27, %v345_v25 }
 0x113   : > { %v399_v34 = vld [vmem:[#allocation3] sm:$0xff] (%p360_p6) }
 0x114   : > { %359 = vst.msk [vmem:[#allocation3 + $0x8] sm:$0xff] %vm341_vm2, %v357_v28 }
 0x119   : > { %v368_v29 = vld [vmem:[#allocation2 + $0x8] sm:$0xff] }
 0x11a   : > { %390 = vmatpush.msra.mxu0 %v368_v29  ;;  %539 = vmatpush.msra.mxu2 %v368_v29 }
 0x11b   : > { %v400_v31 = vld [vmem:[#allocation3 + $0x8] sm:$0xff] }
 0x11c   : > { %415 = vmatpush.msra.mxu1 %v400_v31  ;;  %541 = vmatpush.msra.mxu3 %v400_v31 }
 0x11d   : > { %391 = vmatpush.msra.mxu0 %v367_v30  ;;  %540 = vmatpush.msra.mxu2 %v367_v30 }
 0x11e   : > { %528 = vmatmul.msk.f32.vlgmr.msra.gmra.mxu0 %vm369_vm3, %v365_v32  ;;  %529 = vmatmul.msk.f32.vlgmr.msra.gmra.mxu2 %vm369_vm3, %v366_v33 }
 0x11f   : > { %416 = vmatpush.msra.mxu1 %v399_v34  ;;  %542 = vmatpush.msra.mxu3 %v399_v34 }
 0x120   : > { %530 = vmatmul.msk.f32.vlgmr.msra.gmra.mxu1 %vm369_vm3, %v365_v32  ;;  %531 = vmatmul.msk.f32.vlgmr.msra.gmra.mxu3 %vm369_vm3, %v366_v33 }
 0x19b   : > { %v393_v35 = vpop.f32.mrf.mxu0 }
 0x19c   : > { %v424_v36 = vmul.f32 0.00048828125, %v393_v35 }
 0x19d   : > { %v418_v37 = vpop.f32.mrf.mxu1 }
 0x19e   : > { %v428_v38 = vmul.f32 %v424_v36, %v424_v36  ;;  %v426_v39 = vmul.f32 0.00048828125, %v418_v37 }
 0x1a0   : > { %v430_v40 = vsub.f32 %v426_v39, %v428_v38 }
 0x1a1   : > { %v396_v41 = vpop.f32.mrf.mxu2 }
 0x1a2   : > { %v432_v42 = vadd.f32 1e-05, %v430_v40  ;;  %v425_v43 = vmul.f32 0.00048828125, %v396_v41 }
 0x1a3   : > { %v421_v44 = vpop.f32.mrf.mxu3 }
 0x1a4   : > { %568 = vrsqrt.f32 %v432_v42  ;;  %v429_v45 = vmul.f32 %v425_v43, %v425_v43  ;;  %v427_v46 = vmul.f32 0.00048828125, %v421_v44  ;;  %vm440_vm4 = vweird.f32 %v432_v42 }
 0x1a6   : > { %v431_v47 = vsub.f32 %v427_v46, %v429_v45 }
 0x1a8   : > { %v433_v48 = vadd.f32 1e-05, %v431_v47 }
 0x1aa   : > { %v569_v49 = vpop.eup %568  ;;  %570 = vrsqrt.f32 %v433_v48  ;;  %vm450_vm8 = vweird.f32 %v433_v48 }
 0x1ab   : > { %v435_v50 = vmul.f32 %v569_v49, %v432_v42  ;;  %vm441_vm5 = vweird.f32 %v569_v49 }
 0x1ac   : > { %vm442_vm6 = vmor %vm440_vm4, %vm441_vm5 }
 0x1ad   : > { %v436_v51 = vmul.f32 %v569_v49, %v435_v50 }
 0x1af   : > { %v437_v52 = vmul.f32 0.5, %v436_v51 }
 0x1b0   : > { %v571_v53 = vpop.eup %570 }
 0x1b1   : > { %v438_v54 = vsub.f32 1.5, %v437_v52  ;;  %v445_v55 = vmul.f32 %v571_v53, %v433_v48  ;;  %vm451_vm7 = vweird.f32 %v571_v53 }
 0x1b2   : > { %vm452_vm9 = vmor %vm450_vm8, %vm451_vm7 }
 0x1b3   : > { %v439_v56 = vmul.f32 %v569_v49, %v438_v54  ;;  %v446_v58 = vmul.f32 %v571_v53, %v445_v55 }
 0x1b5   : > { %v443_v59 = vsel %vm442_vm6, %v569_v49, %v439_v56  ;;  %v447_v60 = vmul.f32 0.5, %v446_v58 }
 0x1b6   : > { %v456_v61 = vmul.f32 %v454_v57, %v443_v59 }
 0x1b7   : > { %v448_v63 = vsub.f32 1.5, %v447_v60 }
 0x1b8   : > { %458 = vst.msk [vmem:[%s719_s5] sm:$0xff] %vm341_vm2, %v456_v61  ;;  %v462_v0 = vmul.f32 %v456_v61, %v424_v36 }
 0x1b9   : > { %v449_v1 = vmul.f32 %v571_v53, %v448_v63 }
 0x1ba   : > { %v464_v3 = vsub.f32 %v460_v62, %v462_v0 }
 0x1bb   : > { %v453_v4 = vsel %vm452_vm9, %v571_v53, %v449_v1 }
 0x1bc   : > { %466 = vst.msk [vmem:[%s720_s6] sm:$0xff] %vm341_vm2, %v464_v3  ;;  %v457_v5 = vmul.f32 %v455_v2, %v453_v4 }
 0x1be   : > { %459 = vst.msk [vmem:[%s719_s5 + $0x8] sm:$0xff] %vm341_vm2, %v457_v5  ;;  %v463_v7 = vmul.f32 %v457_v5, %v425_v43 }
 0x1c0   : > { %v465_v8 = vsub.f32 %v461_v6, %v463_v7 }
 0x1c2   : > { %467 = vst.msk [vmem:[%s720_s6 + $0x8] sm:$0xff] %vm341_vm2, %v465_v8 }
 0x1c3 PF: > { %s17_s23 = sadd.s32 1, %s594_s23   ;;  %s721_s21 = smov %s590_s22 }
 0x1c4   : > { %p14_p7 = scmp.ge.s32.totalorder %s17_s23, 4   ;;  %s722_s22 = smov %s724_s24 }
 0x1c6   :  { %16 = sbr.rel (!%p14_p7) target bundleno = 2 (0x2), region = 82 }

</bundles_post_ra>
